<compile_context>
chip_gen: v5e
topology: v5e:2x2
jax: 0.10.0
libtpu: 0.0.40
codegen_flags: <defaults>
</compile_context>

<pallas_src>
import functools

import jax
import jax.numpy as jnp
from jax.experimental import pallas as pl
from jax.experimental.pallas import tpu as pltpu


# ----------------------------------------------------------------------------
# Pallas kernel
# ----------------------------------------------------------------------------
def _wls_kernel(w_ref, g_ref, beta_ref, acc_ref, *, ncomp, r, order, reg):
    """One batch element, one HW chunk.

    w_ref:    (1, ncomp*r, chunk)  packed per-pixel weights; row k*r+s = class k,
                                   HW segment s (class-major sublane packing).
    g_ref:    (1, 2*r, chunk)      packed coordinates: rows [0:r) = x segments,
                                   rows [r:2r) = raw grid y segments.
    beta_ref: (1, ncomp, order+1)  output polynomial coefficients.
    acc_ref:  (ncomp*r, 3*order+2) VMEM f32 moment accumulator:
              cols [0 .. 2*order]   : m_p = sum w^2 * y^p   (per packed row)
              cols [2*order+1 .. ]  : s_p = sum w^2 * x * y^p
    """
    j = pl.program_id(1)
    n_m = 2 * order + 1        # number of pure-y moments

    @pl.when(j == 0)
    def _():
        acc_ref[...] = jnp.zeros_like(acc_ref)

    w = w_ref[0]                               # (rows, chunk)
    x_seg = g_ref[0, 0:r, :]                   # (r, chunk)
    y_seg = 1.0 - g_ref[0, r:2 * r, :]         # (r, chunk)

    # Tile the narrow coordinate rows across the ncomp classes so they line up
    # with the class-major sublane packing of w.
    if ncomp > 1:
        x_t = jnp.concatenate([x_seg] * ncomp, axis=0)   # (rows, chunk)
        y_t = jnp.concatenate([y_seg] * ncomp, axis=0)
    else:
        x_t, y_t = x_seg, y_seg

    wsq = w * w
    wx = wsq * x_t

    # Independent powers of y (short, branch-free dependency chain).
    y2 = y_t * y_t if order >= 1 else None
    y3 = y2 * y_t if order >= 2 else None
    y4 = y2 * y2 if order >= 2 else None
    pows = [None, y_t, y2, y3, y4]

    partials = [jnp.sum(wsq, axis=-1, keepdims=True)]          # m_0
    for p in range(1, 2 * order + 1):                           # m_1 .. m_{2q}
        partials.append(jnp.sum(wsq * pows[p], axis=-1, keepdims=True))
    partials.append(jnp.sum(wx, axis=-1, keepdims=True))        # s_0
    for p in range(1, order + 1):                               # s_1 .. s_q
        partials.append(jnp.sum(wx * pows[p], axis=-1, keepdims=True))

    # Single vreg-sized accumulator update per chunk (instead of n_mom RMWs).
    acc_ref[...] += jnp.concatenate(partials, axis=-1)          # (rows, n_mom)

    # Finalize on the last HW chunk: fold the r segment rows per class, then
    # solve the (order+1)x(order+1) normal equations with the closed-form
    # (adjugate) inverse — matches torch.inverse.
    @pl.when(j == pl.num_programs(1) - 1)
    def _():
        acc = acc_ref[...]                                      # (rows, n_mom)
        if r > 1:
            per_class = []
            for k in range(ncomp):
                row = acc[k * r:k * r + 1, :]
                for t in range(1, r):
                    row = row + acc[k * r + t:k * r + t + 1, :]
                per_class.append(row)
            mom = jnp.concatenate(per_class, axis=0)            # (ncomp, n_mom)
        else:
            mom = acc

        m = [mom[:, p:p + 1] for p in range(2 * order + 1)]
        s = [mom[:, n_m + p:n_m + p + 1] for p in range(order + 1)]

        if order == 0:
            cols = [s[0] / (m[0] + reg)]
        elif order == 1:
            # A = [[m2+r, m1], [m1, m0+r]],  rhs = [s1, s0]
            a, b = m[2] + reg, m[1]
            c = m[0] + reg
            inv_det = 1.0 / (a * c - b * b)
            cols = [(c * s[1] - b * s[0]) * inv_det,
                    (a * s[0] - b * s[1]) * inv_det]
        else:  # order == 2
            # A = [[m4+r, m3, m2], [m3, m2+r, m1], [m2, m1, m0+r]], rhs=[s2,s1,s0]
            a, b, c = m[4] + reg, m[3], m[2]
            d_, e = m[2] + reg, m[1]
            f = m[0] + reg
            A00 = d_ * f - e * e
            A01 = c * e - b * f
            A02 = b * e - c * d_
            A11 = a * f - c * c
            A12 = b * c - a * e
            A22 = a * d_ - b * b
            inv_det = 1.0 / (a * A00 + b * A01 + c * A02)
            r2, r1, r0 = s[2], s[1], s[0]
            cols = [(A00 * r2 + A01 * r1 + A02 * r0) * inv_det,
                    (A01 * r2 + A11 * r1 + A12 * r0) * inv_det,
                    (A02 * r2 + A12 * r1 + A22 * r0) * inv_det]

        beta_ref[0, :, :] = jnp.concatenate(cols, axis=-1)      # (ncomp, d)


# ----------------------------------------------------------------------------
# Wrapper
# ----------------------------------------------------------------------------
_CHUNK_CAP = 32 * 1024   # lanes per grid step -> 1 MiB f32 W block at 8 sublanes


def _pick_chunk(L, cap=_CHUNK_CAP):
    """Largest legal lane-chunk of the packed HW axis (multiple of 128 or full)."""
    if L <= cap:
        return L
    c = (cap // 128) * 128
    while c >= 128:
        if L % c == 0:
            return c
        c -= 128
    return L   # no 128-aligned divisor: single full-extent block


def weighted_least_squares(W, grid, *, nclasses, order, reg_ls=0.0,
                           use_cholesky=False):
    """Forward of Weighted_least_squares.

    W:    anything that views to (N, nclasses, H*W)  (per-pixel class weights)
    grid: (N, H*W, 2) normalized coordinates; grid[...,0]=x, grid[...,1]=y.
    Returns (beta0, beta1, beta2, beta3); beta2/beta3 are None when nclasses <= 3.
    """
    if order not in (0, 1, 2):
        raise NotImplementedError(
            'Requested order {} for polynomial fit is not implemented'.format(order))
    # TODO(synk): use_cholesky=True branch (torch.potrf / torch.trtrs per-image
    # loop) is not reproduced; the default inverse path (identical result) is used.
    del use_cholesky

    N, HW, _ = grid.shape
    d = order + 1
    n_mom = 3 * order + 2
    ncomp = 4 if nclasses > 3 else 2          # torch only fits classes 0,1(,2,3)

    W = W.reshape(N, nclasses, HW)[:, :ncomp, :].astype(jnp.float32)

    # Sublane packing factor: fill all 8 f32 sublanes when HW allows it.
    r = 8 // ncomp
    if HW % r != 0:
        r = 1                                  # fallback: unpacked (rare)
    L = HW // r
    rows = ncomp * r

    W_p = W.reshape(N, rows, L)                # free row-major view (class-major)
    # One transpose pass over grid; x / (1-y) are computed inside the kernel.
    G = jnp.transpose(grid.astype(jnp.float32), (0, 2, 1)).reshape(N, 2 * r, L)

    chunk = _pick_chunk(L)
    n_chunks = max(L // chunk, 1)

    kernel = functools.partial(_wls_kernel, ncomp=ncomp, r=r, order=order,
                               reg=float(reg_ls))
    betas = pl.pallas_call(
        kernel,
        out_shape=jax.ShapeDtypeStruct((N, ncomp, d), jnp.float32),
        grid_spec=pltpu.PrefetchScalarGridSpec(
            num_scalar_prefetch=0,
            grid=(N, n_chunks),                # batch parallel, HW reduction last
            in_specs=[
                pl.BlockSpec((1, rows, chunk), lambda b, j: (b, 0, j)),
                pl.BlockSpec((1, 2 * r, chunk), lambda b, j: (b, 0, j)),
            ],
            out_specs=pl.BlockSpec((1, ncomp, d), lambda b, j: (b, 0, 0)),
            scratch_shapes=[pltpu.VMEM((rows, n_mom), jnp.float32)],
        ),
        compiler_params=pltpu.CompilerParams(
            dimension_semantics=("parallel", "arbitrary"),
            vmem_limit_bytes=32 * 1024 * 1024),
    )(W_p, G)

    beta0 = betas[:, 0, :, None]
    beta1 = betas[:, 1, :, None]
    beta2 = betas[:, 2, :, None] if nclasses > 3 else None
    beta3 = betas[:, 3, :, None] if nclasses > 3 else None
    return beta0, beta1, beta2, beta3


# ----------------------------------------------------------------------------
# Pure-JAX reference (mirrors the PyTorch forward, torch.inverse path)
# ----------------------------------------------------------------------------
def wls_reference(W, grid, nclasses, order, reg_ls):
    N, HW, _ = grid.shape
    Wv = W.reshape(N, nclasses, HW).astype(jnp.float32)
    x_map = grid[:, :, 0][..., None]
    y_map = (1.0 - grid[:, :, 1])[..., None]
    ones = jnp.ones((N, HW, 1), jnp.float32)
    if order == 0:
        Y = ones
    elif order == 1:
        Y = jnp.concatenate([y_map, ones], axis=2)
    else:
        Y = jnp.concatenate([y_map ** 2, y_map, ones], axis=2)
    reg = reg_ls * jnp.eye(order + 1, dtype=jnp.float32)

    def fit(k):
        Wk = Wv[:, k, :][..., None]                       # (N, HW, 1)
        Yk = Wk * Y                                       # (N, HW, d)
        Z = jnp.einsum('npi,npj->nij', Yk, Yk) + reg
        X = jnp.einsum('npi,npj->nij', Yk, Wk * x_map)    # (N, d, 1)
        return jnp.linalg.solve(Z, X)

    beta0, beta1 = fit(0), fit(1)
    beta2 = fit(2) if nclasses > 3 else None
    beta3 = fit(3) if nclasses > 3 else None
    return beta0, beta1, beta2, beta3


# ----------------------------------------------------------------------------
if __name__ == "__main__":
    key = jax.random.PRNGKey(0)
    # Module ctor: size=(N, C, H, W) — small shapes consistent with the LSQ head.
    N, C, H, Wsp = 2, 4, 16, 16
    nclasses, order, reg_ls = 4, 2, 1.0
    HW = H * Wsp

    kw, kg = jax.random.split(key)
    W_in = jax.random.uniform(kw, (N, nclasses, H, Wsp), dtype=jnp.float32)
    grid_in = jax.random.uniform(kg, (N, HW, 2), dtype=jnp.float32)

    fwd = jax.jit(functools.partial(weighted_least_squares,
                                    nclasses=nclasses, order=order,
                                    reg_ls=reg_ls))
    beta0, beta1, beta2, beta3 = jax.block_until_ready(fwd(W_in, grid_in))

    d = order + 1
    assert beta0.shape == (N, d, 1) and beta1.shape == (N, d, 1)
    assert beta2.shape == (N, d, 1) and beta3.shape == (N, d, 1)
    for b in (beta0, beta1, beta2, beta3):
        assert b.dtype == jnp.float32
        assert bool(jnp.all(jnp.isfinite(b)))

    # Cross-check against the pure-JAX reference of the PyTorch forward.
    r0, r1, r2, r3 = wls_reference(W_in, grid_in, nclasses, order, reg_ls)
    for got, ref in ((beta0, r0), (beta1, r1), (beta2, r2), (beta3, r3)):
        assert bool(jnp.allclose(got, ref, rtol=1e-2, atol=1e-2))

    # Also exercise the 2-class / order-1 path (ncomp=2 -> 4 packed segments).
    fwd2 = jax.jit(functools.partial(weighted_least_squares,
                                     nclasses=2, order=1, reg_ls=reg_ls))
    W2 = W_in[:, :2]
    b0, b1, b2, b3 = jax.block_until_ready(fwd2(W2, grid_in))
    q0, q1, _, _ = wls_reference(W2, grid_in, 2, 1, reg_ls)
    assert b2 is None and b3 is None
    assert bool(jnp.allclose(b0, q0, rtol=1e-2, atol=1e-2))
    assert bool(jnp.allclose(b1, q1, rtol=1e-2, atol=1e-2))

    print("KERNEL_OK")
</pallas_src>

<mosaic_0001>
module attributes {stable_mosaic.version = 11 : i64} {
  func.func @_wls_kernel(%arg0: i32, %arg1: i32, %arg2: memref<1x8x128xf32, #tpu.memory_space<vmem>>, %arg3: memref<1x4x128xf32, #tpu.memory_space<vmem>>, %arg4: memref<1x4x3xf32, #tpu.memory_space<vmem>>, %arg5: memref<8x8xf32, #tpu.memory_space<vmem>>) attributes {dimension_semantics = [#tpu.dimension_semantics<parallel>, #tpu.dimension_semantics<arbitrary>], iteration_bounds = array<i64: 2, 1>, scalar_prefetch = 0 : i64, scratch_operands = 1 : i64, tpu.core_type = #tpu.core_type<tc>, window_params = [{transform_indices = @transform_0, window_bounds = array<i64: 1, 8, 128>}, {transform_indices = @transform_1, window_bounds = array<i64: 1, 4, 128>}, {transform_indices = @transform_2, window_bounds = array<i64: 1, 4, 3>}]} {
    %c0_i32 = arith.constant 0 : i32
    %0 = arith.cmpi eq, %arg1, %c0_i32 : i32
    %1 = arith.extui %0 : i1 to i32
    %c0_i32_0 = arith.constant 0 : i32
    %2 = arith.cmpi ne, %1, %c0_i32_0 : i32
    scf.if %2 {
      %cst_22 = arith.constant 0.000000e+00 : f32
      %47 = vector.broadcast %cst_22 : f32 to vector<8x8xf32>
      %c0_23 = arith.constant 0 : index
      %c0_24 = arith.constant 0 : index
      %48 = vector.load %arg5[%c0_23, %c0_24] : memref<8x8xf32, #tpu.memory_space<vmem>>, vector<8x8xf32>
      tpu.vector_store %arg5[%c0_23, %c0_24], %47 {strides = array<i32>} : memref<8x8xf32, #tpu.memory_space<vmem>>, vector<8x8xf32>,
    } else {
    }
    %c0 = arith.constant 0 : index
    %c0_1 = arith.constant 0 : index
    %c0_2 = arith.constant 0 : index
    %3 = vector.load %arg2[%c0, %c0_1, %c0_2] : memref<1x8x128xf32, #tpu.memory_space<vmem>>, vector<1x8x128xf32>
    %4 = vector.shape_cast %3 : vector<1x8x128xf32> to vector<8x128xf32>
    %c0_3 = arith.constant 0 : index
    %c0_4 = arith.constant 0 : index
    %c0_5 = arith.constant 0 : index
    %5 = vector.load %arg3[%c0_3, %c0_4, %c0_5] : memref<1x4x128xf32, #tpu.memory_space<vmem>>, vector<1x2x128xf32>
    %6 = vector.shape_cast %5 : vector<1x2x128xf32> to vector<2x128xf32>
    %c0_6 = arith.constant 0 : index
    %c2 = arith.constant 2 : index
    %c0_7 = arith.constant 0 : index
    %7 = vector.load %arg3[%c0_6, %c2, %c0_7] : memref<1x4x128xf32, #tpu.memory_space<vmem>>, vector<1x2x128xf32>
    %8 = vector.shape_cast %7 : vector<1x2x128xf32> to vector<2x128xf32>
    %cst = arith.constant 1.000000e+00 : f32
    %9 = vector.broadcast %cst : f32 to vector<2x128xf32>
    %10 = arith.subf %9, %8 : vector<2x128xf32>
    %11 = tpu.concatenate %6, %6, %6, %6 in 0 : vector<2x128xf32>, vector<2x128xf32>, vector<2x128xf32>, vector<2x128xf32> -> vector<8x128xf32>
    %12 = tpu.concatenate %10, %10, %10, %10 in 0 : vector<2x128xf32>, vector<2x128xf32>, vector<2x128xf32>, vector<2x128xf32> -> vector<8x128xf32>
    %13 = arith.mulf %4, %4 : vector<8x128xf32>
    %14 = arith.mulf %13, %11 : vector<8x128xf32>
    %15 = arith.mulf %12, %12 : vector<8x128xf32>
    %16 = arith.mulf %15, %12 : vector<8x128xf32>
    %17 = arith.mulf %15, %15 : vector<8x128xf32>
    %cst_8 = arith.constant dense<0.000000e+00> : vector<8xf32>
    %18 = vector.multi_reduction <add>, %13, %cst_8 [1] : vector<8x128xf32> to vector<8xf32>
    %19 = vector.shape_cast %18 : vector<8xf32> to vector<8x1xf32>
    %20 = arith.mulf %13, %12 : vector<8x128xf32>
    %cst_9 = arith.constant dense<0.000000e+00> : vector<8xf32>
    %21 = vector.multi_reduction <add>, %20, %cst_9 [1] : vector<8x128xf32> to vector<8xf32>
    %22 = vector.shape_cast %21 : vector<8xf32> to vector<8x1xf32>
    %23 = arith.mulf %13, %15 : vector<8x128xf32>
    %cst_10 = arith.constant dense<0.000000e+00> : vector<8xf32>
    %24 = vector.multi_reduction <add>, %23, %cst_10 [1] : vector<8x128xf32> to vector<8xf32>
    %25 = vector.shape_cast %24 : vector<8xf32> to vector<8x1xf32>
    %26 = arith.mulf %13, %16 : vector<8x128xf32>
    %cst_11 = arith.constant dense<0.000000e+00> : vector<8xf32>
    %27 = vector.multi_reduction <add>, %26, %cst_11 [1] : vector<8x128xf32> to vector<8xf32>
    %28 = vector.shape_cast %27 : vector<8xf32> to vector<8x1xf32>
    %29 = arith.mulf %13, %17 : vector<8x128xf32>
    %cst_12 = arith.constant dense<0.000000e+00> : vector<8xf32>
    %30 = vector.multi_reduction <add>, %29, %cst_12 [1] : vector<8x128xf32> to vector<8xf32>
    %31 = vector.shape_cast %30 : vector<8xf32> to vector<8x1xf32>
    %cst_13 = arith.constant dense<0.000000e+00> : vector<8xf32>
    %32 = vector.multi_reduction <add>, %14, %cst_13 [1] : vector<8x128xf32> to vector<8xf32>
    %33 = vector.shape_cast %32 : vector<8xf32> to vector<8x1xf32>
    %34 = arith.mulf %14, %12 : vector<8x128xf32>
    %cst_14 = arith.constant dense<0.000000e+00> : vector<8xf32>
    %35 = vector.multi_reduction <add>, %34, %cst_14 [1] : vector<8x128xf32> to vector<8xf32>
    %36 = vector.shape_cast %35 : vector<8xf32> to vector<8x1xf32>
    %37 = arith.mulf %14, %15 : vector<8x128xf32>
    %cst_15 = arith.constant dense<0.000000e+00> : vector<8xf32>
    %38 = vector.multi_reduction <add>, %37, %cst_15 [1] : vector<8x128xf32> to vector<8xf32>
    %39 = vector.shape_cast %38 : vector<8xf32> to vector<8x1xf32>
    %c0_16 = arith.constant 0 : index
    %c0_17 = arith.constant 0 : index
    %40 = vector.load %arg5[%c0_16, %c0_17] : memref<8x8xf32, #tpu.memory_space<vmem>>, vector<8x8xf32>
    %41 = tpu.concatenate %19, %22, %25, %28, %31, %33, %36, %39 in 1 : vector<8x1xf32>, vector<8x1xf32>, vector<8x1xf32>, vector<8x1xf32>, vector<8x1xf32>, vector<8x1xf32>, vector<8x1xf32>, vector<8x1xf32> -> vector<8x8xf32>
    %42 = arith.addf %40, %41 : vector<8x8xf32>
    %c0_18 = arith.constant 0 : index
    %c0_19 = arith.constant 0 : index
    %43 = vector.load %arg5[%c0_18, %c0_19] : memref<8x8xf32, #tpu.memory_space<vmem>>, vector<8x8xf32>
    tpu.vector_store %arg5[%c0_18, %c0_19], %42 {strides = array<i32>} : memref<8x8xf32, #tpu.memory_space<vmem>>, vector<8x8xf32>,
    %c0_i32_20 = arith.constant 0 : i32
    %44 = arith.cmpi eq, %arg1, %c0_i32_20 : i32
    %45 = arith.extui %44 : i1 to i32
    %c0_i32_21 = arith.constant 0 : i32
    %46 = arith.cmpi ne, %45, %c0_i32_21 : i32
    scf.if %46 {
      %c0_22 = arith.constant 0 : index
      %c0_23 = arith.constant 0 : index
      %47 = vector.load %arg5[%c0_22, %c0_23] : memref<8x8xf32, #tpu.memory_space<vmem>>, vector<8x8xf32>
      %48 = vector.extract_strided_slice %47 {offsets = [0, 0], sizes = [1, 8], strides = [1, 1]} : vector<8x8xf32> to vector<1x8xf32>
      %49 = vector.extract_strided_slice %47 {offsets = [1, 0], sizes = [1, 8], strides = [1, 1]} : vector<8x8xf32> to vector<1x8xf32>
      %50 = arith.addf %48, %49 : vector<1x8xf32>
      %51 = vector.extract_strided_slice %47 {offsets = [2, 0], sizes = [1, 8], strides = [1, 1]} : vector<8x8xf32> to vector<1x8xf32>
      %52 = vector.extract_strided_slice %47 {offsets = [3, 0], sizes = [1, 8], strides = [1, 1]} : vector<8x8xf32> to vector<1x8xf32>
      %53 = arith.addf %51, %52 : vector<1x8xf32>
      %54 = vector.extract_strided_slice %47 {offsets = [4, 0], sizes = [1, 8], strides = [1, 1]} : vector<8x8xf32> to vector<1x8xf32>
      %55 = vector.extract_strided_slice %47 {offsets = [5, 0], sizes = [1, 8], strides = [1, 1]} : vector<8x8xf32> to vector<1x8xf32>
      %56 = arith.addf %54, %55 : vector<1x8xf32>
      %57 = vector.extract_strided_slice %47 {offsets = [6, 0], sizes = [1, 8], strides = [1, 1]} : vector<8x8xf32> to vector<1x8xf32>
      %58 = vector.extract_strided_slice %47 {offsets = [7, 0], sizes = [1, 8], strides = [1, 1]} : vector<8x8xf32> to vector<1x8xf32>
      %59 = arith.addf %57, %58 : vector<1x8xf32>
      %60 = tpu.concatenate %50, %53, %56, %59 in 0 : vector<1x8xf32>, vector<1x8xf32>, vector<1x8xf32>, vector<1x8xf32> -> vector<4x8xf32>
      %61 = vector.extract_strided_slice %60 {offsets = [0, 0], sizes = [4, 1], strides = [1, 1]} : vector<4x8xf32> to vector<4x1xf32>
      %62 = vector.extract_strided_slice %60 {offsets = [0, 1], sizes = [4, 1], strides = [1, 1]} : vector<4x8xf32> to vector<4x1xf32>
      %63 = vector.extract_strided_slice %60 {offsets = [0, 2], sizes = [4, 1], strides = [1, 1]} : vector<4x8xf32> to vector<4x1xf32>
      %64 = vector.extract_strided_slice %60 {offsets = [0, 3], sizes = [4, 1], strides = [1, 1]} : vector<4x8xf32> to vector<4x1xf32>
      %65 = vector.extract_strided_slice %60 {offsets = [0, 4], sizes = [4, 1], strides = [1, 1]} : vector<4x8xf32> to vector<4x1xf32>
      %66 = vector.extract_strided_slice %60 {offsets = [0, 5], sizes = [4, 1], strides = [1, 1]} : vector<4x8xf32> to vector<4x1xf32>
      %67 = vector.extract_strided_slice %60 {offsets = [0, 6], sizes = [4, 1], strides = [1, 1]} : vector<4x8xf32> to vector<4x1xf32>
      %68 = vector.extract_strided_slice %60 {offsets = [0, 7], sizes = [4, 1], strides = [1, 1]} : vector<4x8xf32> to vector<4x1xf32>
      %cst_24 = arith.constant 1.000000e+00 : f32
      %69 = vector.broadcast %cst_24 : f32 to vector<4x1xf32>
      %70 = arith.addf %65, %69 : vector<4x1xf32>
      %cst_25 = arith.constant 1.000000e+00 : f32
      %71 = vector.broadcast %cst_25 : f32 to vector<4x1xf32>
      %72 = arith.addf %63, %71 : vector<4x1xf32>
      %cst_26 = arith.constant 1.000000e+00 : f32
      %73 = vector.broadcast %cst_26 : f32 to vector<4x1xf32>
      %74 = arith.addf %61, %73 : vector<4x1xf32>
      %75 = arith.mulf %72, %74 : vector<4x1xf32>
      %76 = arith.mulf %62, %62 : vector<4x1xf32>
      %77 = arith.subf %75, %76 : vector<4x1xf32>
      %78 = arith.mulf %63, %62 : vector<4x1xf32>
      %79 = arith.mulf %64, %74 : vector<4x1xf32>
      %80 = arith.subf %78, %79 : vector<4x1xf32>
      %81 = arith.mulf %64, %62 : vector<4x1xf32>
      %82 = arith.mulf %63, %72 : vector<4x1xf32>
      %83 = arith.subf %81, %82 : vector<4x1xf32>
      %84 = arith.mulf %70, %74 : vector<4x1xf32>
      %85 = arith.mulf %63, %63 : vector<4x1xf32>
      %86 = arith.subf %84, %85 : vector<4x1xf32>
      %87 = arith.mulf %64, %63 : vector<4x1xf32>
      %88 = arith.mulf %70, %62 : vector<4x1xf32>
      %89 = arith.subf %87, %88 : vector<4x1xf32>
      %90 = arith.mulf %70, %72 : vector<4x1xf32>
      %91 = arith.mulf %64, %64 : vector<4x1xf32>
      %92 = arith.subf %90, %91 : vector<4x1xf32>
      %93 = arith.mulf %70, %77 : vector<4x1xf32>
      %94 = arith.mulf %64, %80 : vector<4x1xf32>
      %95 = arith.addf %93, %94 : vector<4x1xf32>
      %96 = arith.mulf %63, %83 : vector<4x1xf32>
      %97 = arith.addf %95, %96 : vector<4x1xf32>
      %cst_27 = arith.constant 1.000000e+00 : f32
      %98 = vector.broadcast %cst_27 : f32 to vector<4x1xf32>
      %99 = arith.divf %98, %97 : vector<4x1xf32>
      %100 = arith.mulf %77, %68 : vector<4x1xf32>
      %101 = arith.mulf %80, %67 : vector<4x1xf32>
      %102 = arith.addf %100, %101 : vector<4x1xf32>
      %103 = arith.mulf %83, %66 : vector<4x1xf32>
      %104 = arith.addf %102, %103 : vector<4x1xf32>
      %105 = arith.mulf %104, %99 : vector<4x1xf32>
      %106 = arith.mulf %80, %68 : vector<4x1xf32>
      %107 = arith.mulf %86, %67 : vector<4x1xf32>
      %108 = arith.addf %106, %107 : vector<4x1xf32>
      %109 = arith.mulf %89, %66 : vector<4x1xf32>
      %110 = arith.addf %108, %109 : vector<4x1xf32>
      %111 = arith.mulf %110, %99 : vector<4x1xf32>
      %112 = arith.mulf %83, %68 : vector<4x1xf32>
      %113 = arith.mulf %89, %67 : vector<4x1xf32>
      %114 = arith.addf %112, %113 : vector<4x1xf32>
      %115 = arith.mulf %92, %66 : vector<4x1xf32>
      %116 = arith.addf %114, %115 : vector<4x1xf32>
      %117 = arith.mulf %116, %99 : vector<4x1xf32>
      %118 = tpu.concatenate %105, %111, %117 in 1 : vector<4x1xf32>, vector<4x1xf32>, vector<4x1xf32> -> vector<4x3xf32>
      %c0_28 = arith.constant 0 : index
      %c0_29 = arith.constant 0 : index
      %c0_30 = arith.constant 0 : index
      %119 = vector.load %arg4[%c0_28, %c0_29, %c0_30] : memref<1x4x3xf32, #tpu.memory_space<vmem>>, vector<1x4x3xf32>
      %120 = vector.shape_cast %119 : vector<1x4x3xf32> to vector<4x3xf32>
      %121 = vector.shape_cast %118 : vector<4x3xf32> to vector<1x4x3xf32>
      tpu.vector_store %arg4[%c0_28, %c0_29, %c0_30], %121 {strides = array<i32>} : memref<1x4x3xf32, #tpu.memory_space<vmem>>, vector<1x4x3xf32>,
    } else {
    }
    return
  }
  func.func @transform_0(%arg0: i32, %arg1: i32) -> (i32, i32, i32) {
    %c0_i32 = arith.constant 0 : i32
    %c0_i32_0 = arith.constant 0 : i32
    return %arg0, %c0_i32, %arg1 : i32, i32, i32
  }
  func.func @transform_1(%arg0: i32, %arg1: i32) -> (i32, i32, i32) {
    %c0_i32 = arith.constant 0 : i32
    %c0_i32_0 = arith.constant 0 : i32
    return %arg0, %c0_i32, %arg1 : i32, i32, i32
  }
  func.func @transform_2(%arg0: i32, %arg1: i32) -> (i32, i32, i32) {
    %c0_i32 = arith.constant 0 : i32
    %c0_i32_0 = arith.constant 0 : i32
    %c0_i32_1 = arith.constant 0 : i32
    return %arg0, %c0_i32, %c0_i32_0 : i32, i32, i32
  }
}

</mosaic_0001>

<bundles_post_ra>
// kernel: weighted_least_squares.1
= control target key start
LH: loop header
LB: loop body
LE: loop exit
PB: predicated region body
PF: predicated region fallthrough
CT: control target
= control target key end

     0   :  { %s627_s9 = smov 0   ;;  %s629_s10 = smov 0   ;;  %s729_s0 = inlined_call_operand.vmem [shape: f32[2,8,128], index: 0, kind: input, shape index: {}]   ;;  %s730_s1 = inlined_call_operand.vmem [shape: f32[2,4,128], index: 1, kind: input, shape index: {}]   ;;  %s731_s2 = inlined_call_operand.vmem [shape: f32[2,4,3], index: 2, kind: output, shape index: {}]  }
   0x1   :  { %s631_s11 = smov 0  }
   0x2 LB: > { %s24_s12 = sadd.s32 1, %s596_s10  ;;  %p536_p0 = scmp.ge.s32.totalorder %s600_s11, 1  ;;  %s600_s11 = sphi %s631_s11, %s12_s11   ;;  %s596_s10 = sphi %s629_s10, %s733_s10   ;;  %s592_s9 = sphi %s627_s9, %s732_s9  }
   0x3   : > { %p26_p1 = scmp.ge.s32.totalorder %s24_s12, 2  ;;  %p142_p2 = scmp.lt.s32.totalorder %s600_s11, 3 }
   0x5   : > { %s735_s12 = smov (%p26_p1, %s24_s12), 0  ;;  %p143_p3 = pnand %p536_p0, %p142_p2 }
   0x6   : > { %p172_p4 = scmp.lt.s32.totalorder (!%p143_p3), %s592_s9, 1  ;;  %s603_s21 = smov (!%p143_p3), 1  }
   0x7   : > { %146 = sbr.rel (%p143_p3) target bundleno = 856 (0x358), region = 28  ;;  %s604_s22 = smov (!%p143_p3), 3  }
   0x8   : > { %s605_s23 = smov (!%p143_p3), 2   ;;  %s606_s24 = smov (!%p143_p3), 127  }
   0x9   : > { %s607_s25 = smov (!%p143_p3), 4   ;;  %s608_s26 = smov (!%p143_p3), 126  }
   0xa   : > { %s609_s27 = smov (!%p143_p3), 123   ;;  %s610_s28 = smov (!%p143_p3), 124  }
   0xb   : > { %s611_s29 = smov (!%p143_p3), 125  }
   0xc   : > { %s737_s9 = smov (!%p172_p4, %s592_s9), 1  ;;  %vm207_vm0 = vcmask 1041408   ;;  %vm209_vm1 = vcmask 1043456   ;;  %vm211_vm2 = vcmask 1045504   ;;  %vm194_vm3 = vcmask 64512  }
   0xd   : > { %s537_s13 = sshll.u32 %s737_s9, 3  ;;  %s538_s14 = sshll.u32 %s737_s9, 2  ;;  %v602_v27 = vmov 0.0   ;;  %vm251_vm4 = vcmask 7168   ;;  %vm253_vm5 = vcmask 15360   ;;  %vm255_vm6 = vcmask 23552  }
   0xe   : > { %s178_s17 = scalar_lea.vmem %s729_s0, %s537_s13  ;;  %s185_s20 = scalar_lea.vmem %s730_s1, %s538_s14  ;;  %195 = vst.msk [vmem:[#allocation2] sm:$0xff] %vm194_vm3, %v602_v27  ;;  %vm257_vm7 = vcmask 31744   ;;  %vm259_vm8 = vcmask 39936   ;;  %vm261_vm9 = vcmask 48128   ;;  %vm263_vm10 = vcmask 56320  }
   0xf   : > { %v196_v0 = vld [vmem:[%s178_s17] sm:$0xff]  ;;  %vm283_vm11 = vcmask 1040384   ;;  %vm286_vm12 = vcmask 1042432   ;;  %s189_s4 = scalar_lea.vmem %s731_s2, %s538_s14 }
  0x10   : > { %v198_v1 = vld [vmem:[%s185_s20 + $0x2] sm:$0x3]  ;;  %v197_v2 = vld [vmem:[%s185_s20] sm:$0x3]  ;;  %v223_v3 = vmul.f32 %v196_v0, %v196_v0 }
  0x11   : > { %v199_v4 = vsub.f32 1.0, %v198_v1  ;;  %v201_v5 = vrot.slane %v197_v2, 6  ;;  %v203_v6 = vrot.slane %v197_v2, 4  ;;  %v205_v11 = vrot.slane %v197_v2, 2 }
  0x12   : > { %228 = vadd.xlane.f32.xlu0 %v223_v3 }
  0x13   : > { %v214_v7 = vrot.slane %v199_v4, 6  ;;  %v216_v8 = vrot.slane %v199_v4, 4  ;;  %v218_v9 = vrot.slane %v199_v4, 2  ;;  %v208_v10 = vsel %vm207_vm0, %v197_v2, %v201_v5 }
  0x14   : > { %v210_v13 = vsel %vm209_vm1, %v208_v10, %v203_v6 }
  0x15   : > { %v220_v12 = vsel %vm207_vm0, %v199_v4, %v214_v7  ;;  %v212_v18 = vsel %vm211_vm2, %v210_v13, %v205_v11  ;;  %v250_v40 = vld [vmem:[#allocation2] sm:$0xff] }
  0x16   : > { %v221_v14 = vsel %vm209_vm1, %v220_v12, %v216_v8  ;;  %v224_v21 = vmul.f32 %v223_v3, %v212_v18  ;;  %vm451_vm1 = vcmask 19456  }
  0x17   : > { %v222_v15 = vsel %vm211_vm2, %v221_v14, %v218_v9 }
  0x18   : > { %v230_v16 = vmul.f32 %v223_v3, %v222_v15  ;;  %v225_v17 = vmul.f32 %v222_v15, %v222_v15  ;;  %v244_v24 = vmul.f32 %v224_v21, %v222_v15 }
  0x1a   : > { %v233_v19 = vmul.f32 %v225_v17, %v223_v3  ;;  %v227_v20 = vmul.f32 %v225_v17, %v225_v17  ;;  %231 = vadd.xlane.f32.xlu0 %v230_v16  ;;  %v226_v23 = vmul.f32 %v225_v17, %v222_v15  ;;  %v247_v26 = vmul.f32 %v225_v17, %v224_v21 }
  0x1c   : > { %234 = vadd.xlane.f32.xlu1 %v233_v19  ;;  %v239_v22 = vmul.f32 %v227_v20, %v223_v3  ;;  %v236_v25 = vmul.f32 %v226_v23, %v223_v3 }
  0x1e   : > { %240 = vadd.xlane.f32.xlu2 %v239_v22 }
  0x22   : > { %245 = vadd.xlane.f32.xlu0 %v244_v24 }
  0x24   : > { %237 = vadd.xlane.f32.xlu1 %v236_v25 }
  0x26   : > { %242 = vadd.xlane.f32.xlu2 %v224_v21 }
  0x2c   : > { %248 = vadd.xlane.f32.xlu1 %v247_v26 }
  0x85   : > { %v229_v28 = vpop.xlane.xlu0 %228 }
  0x8d   : > { %v232_v30 = vpop.xlane.xlu0 %231 }
  0x8e   : > { %v252_v32 = vsel %vm251_vm4, %v229_v28, %v232_v30 }
  0x8f   : > { %v235_v29 = vpop.xlane.xlu1 %234 }
  0x90   : > { %v254_v33 = vsel %vm253_vm5, %v252_v32, %v235_v29 }
  0x91   : > { %v241_v31 = vpop.xlane.xlu2 %240 }
  0x95   : > { %v246_v39 = vpop.xlane.xlu0 %245 }
  0x97   : > { %v238_v34 = vpop.xlane.xlu1 %237 }
  0x98   : > { %v256_v35 = vsel %vm255_vm6, %v254_v33, %v238_v34 }
  0x99   : > { %v258_v36 = vsel %vm257_vm7, %v256_v35, %v241_v31  ;;  %v243_v37 = vpop.xlane.xlu2 %242 }
  0x9a   : > { %v260_v38 = vsel %vm259_vm8, %v258_v36, %v243_v37 }
  0x9b   : > { %v262_v41 = vsel %vm261_vm9, %v260_v38, %v246_v39 }
  0x9f   : > { %v249_v42 = vpop.xlane.xlu1 %248 }
  0xa0   : > { %v264_v43 = vsel %vm263_vm10, %v262_v41, %v249_v42 }
  0xa1   : > { %v265_v44 = vadd.f32 %v264_v43, %v250_v40 }
  0xa3   : > { %267 = vst.msk [vmem:[#allocation2] sm:$0xff] %vm194_vm3, %v265_v44 }
  0xaa   : > { %v271_v45 = vld [vmem:[#allocation2] sm:$0xff] }
  0xab   : > { %v273_v46 = vrot.slane %v271_v45, 1 }
  0xad   : > { %v275_v47 = vadd.f32 %v273_v46, %v271_v45 }
  0xaf   : > { %v277_v48 = vrot.slane %v275_v47, 1  ;;  %v279_v49 = vrot.slane %v275_v47, 2  ;;  %v281_v50 = vrot.slane %v275_v47, 3 }
  0xb1   : > { %v284_v51 = vsel %vm283_vm11, %v275_v47, %v277_v48 }
  0xb2   : > { %v285_v52 = vsel %vm207_vm0, %v284_v51, %v279_v49 }
  0xb3   : > { %v287_v53 = vsel %vm286_vm12, %v285_v52, %v281_v50 }
  0xb4   : > { %301 = vrot.lane.b32.xlu0 %v287_v53, %s603_s21  ;;  %v665_v54 = vadd.f32 1.0, %v287_v53  ;;  %v294_v58 = vmul.f32 %v287_v53, %v287_v53 }
  0xb6   : > { %305 = vrot.lane.b32.xlu2 %v665_v54, %s604_s22  ;;  %v318_v55 = vmul.f32 %v665_v54, %v287_v53 }
  0xbc   : > { %320 = vrot.lane.b32.xlu0 %v318_v55, %s603_s21 }
  0xbe   : > { %314 = vrot.lane.b32.xlu2 %v287_v53, %s605_s23 }
  0xc6   : > { %290 = vrot.lane.b32.xlu2 %v665_v54, %s605_s23 }
 0x110   : > { %v306_v56 = vpop.permute.xlu2 %305 }
 0x111   : > { %v308_v57 = vmul.f32 %v306_v56, %v287_v53 }
 0x113   : > { %310 = vrot.lane.b32.xlu1 %v308_v57, %s606_s24 }
 0x118   : > { %v315_v60 = vpop.permute.xlu2 %314 }
 0x119   : > { %v317_v61 = vmul.f32 %v315_v60, %v287_v53 }
 0x11b   : > { %296 = vrot.lane.b32.xlu1 %v294_v58, %s603_s21 }
 0x120   : > { %v291_v0 = vpop.permute.xlu2 %290 }
 0x121   : > { %v293_v5 = vmul.f32 %v291_v0, %v665_v54 }
 0x123   : > { %332 = vrot.lane.b32.xlu1 %v287_v53, %s604_s22 }
 0x126   : > { %v302_v59 = vpop.permute.xlu0 %301 }
 0x127   : > { %v304_v1 = vmul.f32 %v302_v59, %v287_v53 }
 0x12e   : > { %v321_v62 = vpop.permute.xlu0 %320 }
 0x12f   : > { %v675_v63 = vsub.f32 %v317_v61, %v321_v62 }
 0x131   : > { %357 = vrot.lane.b32.xlu2 %v675_v63, %s606_s24 }
 0x185   : > { %v311_v2 = vpop.permute.xlu1 %310 }
 0x186   : > { %v679_v3 = vsub.f32 %v304_v1, %v311_v2 }
 0x188   : > { %347 = vrot.lane.b32.xlu0 %v679_v3, %s603_s21 }
 0x18b   : > { %v358_v4 = vpop.permute.xlu2 %357 }
 0x18c   : > { %v360_v6 = vmul.f32 %v358_v4, %v287_v53 }
 0x18d   : > { %v297_v7 = vpop.permute.xlu1 %296 }
 0x18e   : > { %v684_v8 = vsub.f32 %v293_v5, %v297_v7  ;;  %362 = vrot.lane.b32.xlu1 %v360_v6, %s605_s23 }
 0x190   : > { %342 = vrot.lane.b32.xlu0 %v684_v8, %s605_s23 }
 0x195   : > { %v333_v9 = vpop.permute.xlu1 %332 }
 0x196   : > { %v335_v10 = vmul.f32 %v333_v9, %v665_v54 }
 0x198   : > { %324 = vrot.lane.b32.xlu0 %v665_v54, %s607_s25  ;;  %337 = vrot.lane.b32.xlu1 %v335_v10, %s606_s24 }
 0x1a0   : > { %390 = vrot.lane.b32.xlu0 %v287_v53, %s608_s26  ;;  %381 = vrot.lane.b32.xlu1 %v287_v53, %s609_s27 }
 0x1a8   : > { %385 = vrot.lane.b32.xlu0 %v287_v53, %s610_s28 }
 0x1fa   : > { %v348_v11 = vpop.permute.xlu0 %347 }
 0x1fb   : > { %v350_v12 = vmul.f32 %v348_v11, %v287_v53 }
 0x1fd   : > { %352 = vrot.lane.b32.xlu2 %v350_v12, %s603_s21 }
 0x200   : > { %v363_v15 = vpop.permute.xlu1 %362 }
 0x202   : > { %v343_v13 = vpop.permute.xlu0 %342 }
 0x203   : > { %v345_v21 = vmul.f32 %v343_v13, %v665_v54 }
 0x205   : > { %328 = vrot.lane.b32.xlu2 %v294_v58, %s605_s23 }
 0x20a   : > { %v325_v14 = vpop.permute.xlu0 %324  ;;  %v338_v18 = vpop.permute.xlu1 %337 }
 0x20b   : > { %v340_v19 = vsub.f32 %v304_v1, %v338_v18  ;;  %v327_v25 = vmul.f32 %v325_v14, %v665_v54 }
 0x20d   : > { %424 = vrot.lane.b32.xlu2 %v287_v53, %s606_s24 }
 0x212   : > { %v391_v16 = vpop.permute.xlu0 %390  ;;  %v382_v41 = vpop.permute.xlu1 %381 }
 0x213   : > { %v393_v17 = vmul.f32 %v391_v16, %v675_v63  ;;  %v411_v20 = vmul.f32 %v391_v16, %v340_v19  ;;  %v404_v46 = vmul.f32 %v382_v41, %v679_v3  ;;  %v384_v50 = vmul.f32 %v382_v41, %v684_v8 }
 0x215   : > { %419 = vrot.lane.b32.xlu2 %v287_v53, %s611_s29  ;;  %395 = vrot.lane.b32.xlu0 %v393_v17, %s606_s24 }
 0x21a   : > { %v386_v43 = vpop.permute.xlu0 %385 }
 0x21b   : > { %v388_v47 = vmul.f32 %v386_v43, %v679_v3  ;;  %v418_v52 = vmul.f32 %v386_v43, %v675_v63 }
 0x21d   : > { %413 = vrot.lane.b32.xlu2 %v411_v20, %s606_s24  ;;  %v389_v53 = vadd.f32 %v388_v47, %v384_v50 }
 0x257   : > { %v353_v22 = vpop.permute.xlu2 %352 }
 0x258   : > { %v355_v23 = vadd.f32 %v353_v22, %v345_v21 }
 0x25a   : > { %v365_v24 = vadd.f32 %v363_v15, %v355_v23 }
 0x25c   : > { %576 = vrcp.f32 %v365_v24  ;;  %v377_v32 = vand.u32 2147483648, %v365_v24  ;;  %v375_v35 = vand.u32 2147483647, %v365_v24  ;;  %vm371_vm14 = vweird.f32 %v365_v24 }
 0x25e   : > { %v378_v38 = vor.u32 1.1754944e-38, %v377_v32  ;;  %vm376_vm0 = vcmp.eq.f32.partialorder %v375_v35, 8.507059e+37 }
 0x25f   : > { %v329_v26 = vpop.permute.xlu2 %328 }
 0x260   : > { %v331_v27 = vsub.f32 %v327_v25, %v329_v26 }
 0x262   : > { %v577_v28 = vpop.eup %576  ;;  %v405_v29 = vmul.f32 %v391_v16, %v331_v27 }
 0x263   : > { %v367_v30 = vmul.f32 %v577_v28, %v365_v24  ;;  %vm372_vm13 = vweird.f32 %v577_v28 }
 0x264   : > { %407 = vrot.lane.b32.xlu1 %v405_v29, %s608_s26  ;;  %vm373_vm15 = vmor %vm371_vm14, %vm372_vm13 }
 0x265   : > { %v368_v31 = vsub.f32 1.0, %v367_v30 }
 0x267   : > { %v425_v33 = vpop.permute.xlu2 %424  ;;  %v369_v34 = vmul.f32 %v577_v28, %v368_v31 }
 0x268   : > { %v427_v37 = vmul.f32 %v425_v33, %v684_v8 }
 0x269   : > { %v370_v36 = vadd.f32 %v577_v28, %v369_v34 }
 0x26b   : > { %v374_v39 = vsel %vm373_vm15, %v577_v28, %v370_v36 }
 0x26c   : > { %429 = vrot.lane.b32.xlu1 %v427_v37, %s606_s24  ;;  %v379_v40 = vsel %vm376_vm0, %v378_v38, %v374_v39 }
 0x26d   : > { %433 = vrot.lane.b32.xlu2 %v379_v40, %s606_s24  ;;  %400 = vrot.lane.b32.xlu0 %v379_v40, %s608_s26 }
 0x26f   : > { %v420_v42 = vpop.permute.xlu2 %419 }
 0x270   : > { %v422_v49 = vmul.f32 %v420_v42, %v340_v19 }
 0x272   : > { %v423_v54 = vadd.f32 %v422_v49, %v418_v52 }
 0x277   : > { %v414_v48 = vpop.permute.xlu2 %413 }
 0x287   : > { %v396_v45 = vpop.permute.xlu0 %395 }
 0x288   : > { %v398_v55 = vadd.f32 %v396_v45, %v389_v53 }
 0x2c7   : > { %v434_v60 = vpop.permute.xlu2 %433 }
 0x2d6   : > { %v408_v44 = vpop.permute.xlu1 %407 }
 0x2d7   : > { %v410_v51 = vadd.f32 %v408_v44, %v404_v46 }
 0x2d9   : > { %v416_v56 = vadd.f32 %v414_v48, %v410_v51 }
 0x2de   : > { %v430_v57 = vpop.permute.xlu1 %429 }
 0x2df   : > { %v432_v58 = vadd.f32 %v430_v57, %v423_v54  ;;  %v401_v59 = vpop.permute.xlu0 %400 }
 0x2e0   : > { %v403_v61 = vmul.f32 %v401_v59, %v398_v55  ;;  %v417_v62 = vmul.f32 %v416_v56, %v401_v59 }
 0x2e1   : > { %v436_v0 = vmul.f32 %v434_v60, %v432_v58 }
 0x2e2   : > { %438 = vrot.lane.b32.xlu1 %v403_v61, %s608_s26  ;;  %442 = vrot.lane.b32.xlu0 %v417_v62, %s606_s24 }
 0x2e3   : > { %446 = vrot.lane.b32.xlu2 %v436_v0, %s606_s24 }
 0x33d   : > { %v447_v2 = vpop.permute.xlu2 %446 }
 0x354   : > { %v439_v1 = vpop.permute.xlu1 %438  ;;  %v443_v63 = vpop.permute.xlu0 %442 }
 0x355   : > { %v449_v3 = vsel %vm251_vm4, %v439_v1, %v443_v63 }
 0x356   : > { %v450_v4 = vsel %vm253_vm5, %v449_v3, %v447_v2 }
 0x357   : > { %452 = vst.msk [vmem:[%s189_s4] sm:$0xf] %vm451_vm1, %v450_v4 }
 0x358 PF: > { %s12_s11 = sadd.s32 1, %s600_s11   ;;  %s732_s9 = smov %s596_s10 }
 0x359   : > { %p9_p5 = scmp.ge.s32.totalorder %s12_s11, 4   ;;  %s733_s10 = smov %s735_s12 }
 0x35b   :  { %11 = sbr.rel (!%p9_p5) target bundleno = 2 (0x2), region = 69 }

</bundles_post_ra>
